<compile_context>
chip_gen: v6e
topology: v6e:2x2x1
jax: 0.10.0
libtpu: 0.0.40
codegen_flags: <defaults>
</compile_context>

<pallas_src>
import functools

import jax
import jax.numpy as jnp
from jax.experimental import pallas as pl
from jax.experimental.pallas import tpu as pltpu


_LANES = 128
_SUBLANES = 8


def _distill_loss_kernel(p_ref, s_ref, o_ref, acc_ref, *, inv_d):
    """Accumulate sum((p - s)^2) for one batch row across the reduction grid."""
    k = pl.program_id(1)

    @pl.when(k == 0)
    def _():
        acc_ref[...] = jnp.zeros_like(acc_ref)

    diff = p_ref[...].astype(jnp.float32) - s_ref[...].astype(jnp.float32)
    sq = diff * diff
    # (rows_block, 128) -> (rows_block // 8, 8, 128) is a layout-preserving
    # regrouping (split at the native sublane tile); the axis-0 reduce is plain
    # per-vreg VPU adds, so the steady-state loop does no cross-lane XLU work.
    acc_ref[...] += jnp.sum(sq.reshape(-1, _SUBLANES, _LANES), axis=0)

    @pl.when(k == pl.num_programs(1) - 1)
    def _():
        mean = jnp.sum(acc_ref[...]) * inv_d      # one full reduce per batch row
        o_ref[...] = jnp.broadcast_to(mean, o_ref.shape).astype(o_ref.dtype)


def _choose_rows_block(r8, target_rows):
    """Largest 'nice' multiple-of-8 row tile <= target_rows for r8 total rows."""
    if r8 <= target_rows:
        return r8
    # Prefer a divisor of r8 (no tail padding) as long as it is at least half
    # the target; otherwise take the target and zero-pad the tail.
    lo = max(_SUBLANES, (target_rows // 2) // _SUBLANES * _SUBLANES)
    for cand in range(target_rows, lo - 1, -_SUBLANES):
        if r8 % cand == 0:
            return cand
    return target_rows


def distill_loss(pred, slabel, *, target_block_bytes=2 * 1024 * 1024):
    """Pallas equivalent of DistillLoss.forward(pred, slabel).

    Args:
      pred, slabel: (N, C, H, W) arrays (same shape / dtype).
    Returns:
      (N,) float32 array: per-batch mean squared error over (C, H, W).
    """
    assert pred.shape == slabel.shape
    n = pred.shape[0]
    d = 1
    for s in pred.shape[1:]:
        d *= s

    itemsize = jnp.dtype(pred.dtype).itemsize
    target_rows = max(
        _SUBLANES,
        (target_block_bytes // (_LANES * itemsize)) // _SUBLANES * _SUBLANES,
    )

    r = pl.cdiv(d, _LANES)                      # 128-lane rows per batch item
    r8 = pl.cdiv(r, _SUBLANES) * _SUBLANES      # round rows up to full sublanes
    rows_block = _choose_rows_block(r8, target_rows)
    r_pad = pl.cdiv(r8, rows_block) * rows_block
    d_pad = r_pad * _LANES
    n_steps = r_pad // rows_block

    p2 = pred.reshape(n, d)
    s2 = slabel.reshape(n, d)
    if d_pad != d:
        # Zero padding is exact: padded lanes add 0 to the sum of squares.
        p2 = jnp.pad(p2, ((0, 0), (0, d_pad - d)))
        s2 = jnp.pad(s2, ((0, 0), (0, d_pad - d)))
    p3 = p2.reshape(n * r_pad, _LANES)
    s3 = s2.reshape(n * r_pad, _LANES)

    in_map = lambda b, k: (b * n_steps + k, 0)

    out = pl.pallas_call(
        functools.partial(_distill_loss_kernel, inv_d=1.0 / float(d)),
        out_shape=jax.ShapeDtypeStruct((n, 1, _LANES), jnp.float32),
        grid_spec=pltpu.PrefetchScalarGridSpec(
            num_scalar_prefetch=0,
            grid=(n, n_steps),
            in_specs=[
                pl.BlockSpec((rows_block, _LANES), in_map),
                pl.BlockSpec((rows_block, _LANES), in_map),
            ],
            out_specs=pl.BlockSpec((1, 1, _LANES), lambda b, k: (b, 0, 0)),
            scratch_shapes=[pltpu.VMEM((_SUBLANES, _LANES), jnp.float32)],
        ),
        compiler_params=pltpu.CompilerParams(
            dimension_semantics=("parallel", "arbitrary"),
            vmem_limit_bytes=32 * 1024 * 1024,
        ),
        # TODO(synk): consider pipeline_mode=pl.Buffered(3) on the inputs only
        # if profiling still shows exposed DMA after the larger tiles.
    )(p3, s3)

    return out[:, 0, 0]


if __name__ == "__main__":
    key = jax.random.PRNGKey(0)
    k1, k2 = jax.random.split(key)

    # Small NCHW shapes consistent with the module's segmentation logits.
    N, C, H, W = 2, 4, 16, 16
    pred = jax.random.normal(k1, (N, C, H, W), dtype=jnp.float32)
    slabel = jax.random.normal(k2, (N, C, H, W), dtype=jnp.float32)

    loss = distill_loss(pred, slabel)
    jax.block_until_ready(loss)

    ref = jnp.mean((pred - slabel) ** 2, axis=(1, 2, 3))
    assert loss.shape == (N,)
    assert jnp.allclose(loss, ref, rtol=1e-5, atol=1e-6), (loss, ref)

    # Second case: D = C*H*W not a multiple of 128*8 exercises the zero-pad path.
    N2, C2, H2, W2 = 2, 3, 10, 10
    k3, k4 = jax.random.split(k2)
    pred2 = jax.random.normal(k3, (N2, C2, H2, W2), dtype=jnp.float32)
    slabel2 = jax.random.normal(k4, (N2, C2, H2, W2), dtype=jnp.float32)
    loss2 = distill_loss(pred2, slabel2)
    jax.block_until_ready(loss2)
    ref2 = jnp.mean((pred2 - slabel2) ** 2, axis=(1, 2, 3))
    assert jnp.allclose(loss2, ref2, rtol=1e-5, atol=1e-6), (loss2, ref2)

    print("KERNEL_OK")
</pallas_src>

<mosaic_0001>
module attributes {stable_mosaic.version = 11 : i64} {
  func.func @_distill_loss_kernel(%arg0: i32, %arg1: i32, %arg2: memref<8x128xf32, #tpu.memory_space<vmem>>, %arg3: memref<8x128xf32, #tpu.memory_space<vmem>>, %arg4: memref<1x1x128xf32, #tpu.memory_space<vmem>>, %arg5: memref<8x128xf32, #tpu.memory_space<vmem>>) attributes {dimension_semantics = [#tpu.dimension_semantics<parallel>, #tpu.dimension_semantics<arbitrary>], iteration_bounds = array<i64: 2, 1>, scalar_prefetch = 0 : i64, scratch_operands = 1 : i64, tpu.core_type = #tpu.core_type<tc>, window_params = [{transform_indices = @transform_0, window_bounds = array<i64: 8, 128>}, {transform_indices = @transform_1, window_bounds = array<i64: 8, 128>}, {transform_indices = @transform_2, window_bounds = array<i64: 1, 1, 128>}]} {
    %c0_i32 = arith.constant 0 : i32
    %0 = arith.cmpi eq, %arg1, %c0_i32 : i32
    %1 = arith.extui %0 : i1 to i32
    %c0_i32_0 = arith.constant 0 : i32
    %2 = arith.cmpi ne, %1, %c0_i32_0 : i32
    scf.if %2 {
      %cst_10 = arith.constant 0.000000e+00 : f32
      %15 = vector.broadcast %cst_10 : f32 to vector<8x128xf32>
      %c0_11 = arith.constant 0 : index
      %c0_12 = arith.constant 0 : index
      %16 = vector.load %arg5[%c0_11, %c0_12] : memref<8x128xf32, #tpu.memory_space<vmem>>, vector<8x128xf32>
      tpu.vector_store %arg5[%c0_11, %c0_12], %15 {strides = array<i32>} : memref<8x128xf32, #tpu.memory_space<vmem>>, vector<8x128xf32>,
    } else {
    }
    %c0 = arith.constant 0 : index
    %c0_1 = arith.constant 0 : index
    %3 = vector.load %arg2[%c0, %c0_1] : memref<8x128xf32, #tpu.memory_space<vmem>>, vector<8x128xf32>
    %c0_2 = arith.constant 0 : index
    %c0_3 = arith.constant 0 : index
    %4 = vector.load %arg3[%c0_2, %c0_3] : memref<8x128xf32, #tpu.memory_space<vmem>>, vector<8x128xf32>
    %5 = arith.subf %3, %4 : vector<8x128xf32>
    %6 = arith.mulf %5, %5 : vector<8x128xf32>
    %c0_4 = arith.constant 0 : index
    %c0_5 = arith.constant 0 : index
    %7 = vector.load %arg5[%c0_4, %c0_5] : memref<8x128xf32, #tpu.memory_space<vmem>>, vector<8x128xf32>
    %8 = vector.shape_cast %6 : vector<8x128xf32> to vector<1x8x128xf32>
    %cst = arith.constant dense<0.000000e+00> : vector<8x128xf32>
    %9 = vector.multi_reduction <add>, %8, %cst [0] : vector<1x8x128xf32> to vector<8x128xf32>
    %10 = arith.addf %7, %9 : vector<8x128xf32>
    %c0_6 = arith.constant 0 : index
    %c0_7 = arith.constant 0 : index
    %11 = vector.load %arg5[%c0_6, %c0_7] : memref<8x128xf32, #tpu.memory_space<vmem>>, vector<8x128xf32>
    tpu.vector_store %arg5[%c0_6, %c0_7], %10 {strides = array<i32>} : memref<8x128xf32, #tpu.memory_space<vmem>>, vector<8x128xf32>,
    %c0_i32_8 = arith.constant 0 : i32
    %12 = arith.cmpi eq, %arg1, %c0_i32_8 : i32
    %13 = arith.extui %12 : i1 to i32
    %c0_i32_9 = arith.constant 0 : i32
    %14 = arith.cmpi ne, %13, %c0_i32_9 : i32
    scf.if %14 {
      %c0_10 = arith.constant 0 : index
      %c0_11 = arith.constant 0 : index
      %15 = vector.load %arg5[%c0_10, %c0_11] : memref<8x128xf32, #tpu.memory_space<vmem>>, vector<8x128xf32>
      %16 = vector.shape_cast %15 : vector<8x128xf32> to vector<1x8x128xf32>
      %cst_12 = arith.constant dense<0.000000e+00> : vector<1xf32>
      %17 = vector.multi_reduction <add>, %16, %cst_12 [1, 2] : vector<1x8x128xf32> to vector<1xf32>
      %18 = vector.shape_cast %17 : vector<1xf32> to vector<1x1x1xf32>
      %19 = vector.extract %18[0, 0, 0] : f32 from vector<1x1x1xf32>
      %cst_13 = arith.constant 9.765625E-4 : f32
      %20 = arith.mulf %19, %cst_13 : f32
      %21 = vector.broadcast %20 : f32 to vector<1x1x128xf32>
      %c0_14 = arith.constant 0 : index
      %c0_15 = arith.constant 0 : index
      %c0_16 = arith.constant 0 : index
      %22 = vector.load %arg4[%c0_14, %c0_15, %c0_16] : memref<1x1x128xf32, #tpu.memory_space<vmem>>, vector<1x1x128xf32>
      tpu.vector_store %arg4[%c0_14, %c0_15, %c0_16], %21 {strides = array<i32>} : memref<1x1x128xf32, #tpu.memory_space<vmem>>, vector<1x1x128xf32>,
    } else {
    }
    return
  }
  func.func @transform_0(%arg0: i32, %arg1: i32) -> (i32, i32) {
    %c1_i32 = arith.constant 1 : i32
    %0 = arith.muli %arg0, %c1_i32 : i32
    %1 = arith.addi %0, %arg1 : i32
    %c0_i32 = arith.constant 0 : i32
    %c0_i32_0 = arith.constant 0 : i32
    return %1, %c0_i32 : i32, i32
  }
  func.func @transform_1(%arg0: i32, %arg1: i32) -> (i32, i32) {
    %c1_i32 = arith.constant 1 : i32
    %0 = arith.muli %arg0, %c1_i32 : i32
    %1 = arith.addi %0, %arg1 : i32
    %c0_i32 = arith.constant 0 : i32
    %c0_i32_0 = arith.constant 0 : i32
    return %1, %c0_i32 : i32, i32
  }
  func.func @transform_2(%arg0: i32, %arg1: i32) -> (i32, i32, i32) {
    %c0_i32 = arith.constant 0 : i32
    %c0_i32_0 = arith.constant 0 : i32
    %c0_i32_1 = arith.constant 0 : i32
    return %arg0, %c0_i32, %c0_i32_0 : i32, i32, i32
  }
}

</mosaic_0001>

<bundles_post_ra>
// kernel: tpu_custom_call.1
= control target key start
LH: loop header
LB: loop body
LE: loop exit
PB: predicated region body
PF: predicated region fallthrough
CT: control target
= control target key end

     0   :  { %7 = vsyncpa [#allocation4], 0  ;;  %s767_s0 = inlined_call_operand.hbm [shape: f32[16,128], index: 0, kind: input, shape index: {}]   ;;  %s768_s1 = inlined_call_operand.hbm [shape: f32[16,128], index: 1, kind: input, shape index: {}]   ;;  %s769_s2 = inlined_call_operand.hbm [shape: f32[2,1,128], index: 2, kind: output, shape index: {}]  }
   0x1   :  { %9 = vsyncpa [#allocation4 + $0x1], 0 }
   0x2   :  { %10 = vsyncpa [#allocation7], 0 }
   0x3   :  { %12 = vsyncpa [#allocation7 + $0x1], 0 }
   0x4   :  { %13 = vsyncpa [#allocation5], 0 }
   0x5   :  { %15 = vsyncpa [#allocation5 + $0x1], 0  ;;  %s599_s9 = smov 0   ;;  %s601_s10 = smov 0  }
   0x6   :  { %s603_s11 = smov 0   ;;  %s605_s12 = smov 0  }
   0x7   :  { %s607_s13 = smov 0   ;;  %s609_s14 = smov 0  }
   0x8 LB: > { %s356_s15 = sadd.s32 4294967295, %s579_s14   ;;  %s357_s16 = sadd.s32 4294967294, %s579_s14   ;;  %s579_s14 = sphi %s609_s14, %s21_s14   ;;  %s575_s13 = sphi %s607_s13, %s781_s13   ;;  %s571_s12 = sphi %s605_s12, %s780_s12   ;;  %s567_s11 = sphi %s603_s11, %s779_s11   ;;  %s563_s10 = sphi %s601_s10, %s778_s10   ;;  %s559_s9 = sphi %s599_s9, %s777_s9  }
   0x9   : > { %s33_s17 = sadd.s32 1, %s575_s13  ;;  %s42_s18 = sadd.s32 1, %s567_s11 }
   0xa   : > { %p35_p0 = scmp.ge.s32.totalorder %s33_s17, 2  ;;  %p49_p1 = scmp.ne.s32.totalorder %s567_s11, %s563_s10 }
   0xb   : > { %p50_p2 = scmp.eq.s32.totalorder %s579_s14, 0  ;;  %p55_p3 = scmp.ne.s32.totalorder %s563_s10, %s559_s9 }
   0xc   : > { %s783_s17 = smov (%p35_p0, %s33_s17), 0  ;;  %p56_p5 = scmp.eq.s32.totalorder %s356_s15, 0 }
   0xd   : > { %p640_p4 = por %p50_p2, %p49_p1  ;;  %s39_s20 = ssub.s32 %s575_s13, %s783_s17 }
   0xe   : > { %p107_p6 = scmp.eq.s32.totalorder %s356_s15, 1  ;;  %p40_p7 = scmp.eq.s32.totalorder %s39_s20, 0 }
   0xf   : > { %p646_p8 = por %p56_p5, %p55_p3  ;;  %p113_p10 = scmp.eq.s32.totalorder %s357_s16, 1 }
  0x10   : > { %p650_p9 = por %p107_p6, %p49_p1  ;;  %p389_p13 = scmp.lt.s32.totalorder %s579_s14, 2 }
  0x11   : > { %s655_s23 = scalar_select %p40_p7, %s567_s11, %s42_s18  }
  0x12   : > { %p657_p11 = por %p113_p10, %p55_p3  ;;  %s664_s25 = sand.u32 1, %s567_s11  }
  0x13   : > { %s360_s26 = sshll.u32 %s664_s25, 3  ;;  %s361_s27 = sshll.u32 %s575_s13, 7 }
  0x14   : > { %s143_s30 = scalar_lea.hbm %s767_s0, %s361_s27  ;;  %s137_s3 = scalar_lea.vmem [#allocation3], %s360_s26 }
  0x15   : > { %s145_s4 = sshll.u32 %s137_s3, 4  ;;  %p673_p0 = pnand %p389_p13, %p640_p4  ;;  %s146_s4 = int_to_ptr.vmem [resolvable:$true] %s145_s4 }
  0x16   : > { %p364_p1 = scmp.ge.s32.totalorder %s579_s14, 1  ;;  %p169_p2 = scmp.lt.s32.totalorder %s579_s14, 3 }
  0x17   : > { %s134_s6 = scalar_lea.sflag [#allocation4], %s664_s25  ;;  %p441_p3 = pneg %p673_p0 }
  0x18   : > { %s452_s7 = scalar_lea.vmem %s146_s4, 128  ;;  %s581_s8 = smov [#allocation3]  }
  0x19   : > { %p453_p5 = scmp.ne.s32.totalorder %s146_s4, %s452_s7  ;;  %s457_s15 = sshll.u32 %s581_s8, 4  ;;  %s458_s15 = int_to_ptr.vmem [resolvable:$false] %s457_s15 }
  0x1a   : > { %s459_s16 = scalar_lea.vmem %s458_s15, 256  ;;  %p460_p4 = scmp.lt.s32.totalorder %s146_s4, %s458_s15 }
  0x1b   : > { %p455_p6 = pnand %p453_p5, %p441_p3  ;;  %p461_p10 = scmp.lt.s32.totalorder %s459_s16, %s452_s7 }
  0x1d   : > { %p456_p7 = pneg %p455_p6  ;;  %p462_p13 = por %p461_p10, %p460_p4 }
  0x1f   : > { %p463_p12 = pnand %p462_p13, %p456_p7 }
  0x21   : > { %466 = shalt.err (!%p463_p12)
}
  0x22   : > { %381 = dma.hbm_to_vmem [thread:$0]  (!%p673_p0), %s143_s30, 128, %s146_s4, %s134_s6  }
  0x23   : > { %p691_p5 = pnand %p364_p1, %p169_p2  ;;  %s162_s28 = scalar_lea.hbm %s768_s1, %s361_s27 }
  0x24   : > { %s156_s29 = scalar_lea.vmem [#allocation6], %s360_s26  ;;  %s153_s7 = scalar_lea.sflag [#allocation7], %s664_s25 }
  0x25   : > { %s164_s3 = sshll.u32 %s156_s29, 4  ;;  %s582_s30 = smov [#allocation6]   ;;  %s165_s3 = int_to_ptr.vmem [resolvable:$true] %s164_s3 }
  0x26   : > { %s480_s8 = scalar_lea.vmem %s165_s3, 128  ;;  %s485_s4 = sshll.u32 %s582_s30, 4  ;;  %s486_s4 = int_to_ptr.vmem [resolvable:$false] %s485_s4 }
  0x27   : > { %p481_p12 = scmp.ne.s32.totalorder %s165_s3, %s480_s8  ;;  %s487_s6 = scalar_lea.vmem %s486_s4, 256 }
  0x28   : > { %p488_p1 = scmp.lt.s32.totalorder %s165_s3, %s486_s4  ;;  %p489_p2 = scmp.lt.s32.totalorder %s487_s6, %s480_s8 }
  0x29   : > { %p483_p6 = pnand %p481_p12, %p441_p3 }
  0x2a   : > { %p490_p4 = por %p489_p2, %p488_p1 }
  0x2b   : > { %p484_p7 = pneg %p483_p6 }
  0x2d   : > { %p491_p10 = pnand %p490_p4, %p484_p7 }
  0x2f   : > { %494 = shalt.err (!%p491_p10)
}
  0x30   : > { %384 = dma.hbm_to_vmem [thread:$0]  (!%p673_p0), %s162_s28, 128, %s165_s3, %s153_s7  }
  0x31   : > { %173 = sbr.rel (%p691_p5) target bundleno = 278 (0x116), region = 28  ;;  %s707_s25 = sand.u32 (!%p691_p5), 1, %s563_s10  }
  0x32   : > { %s365_s26 = sshll.u32 (!%p691_p5), %s707_s25, 3  ;;  %s176_s27 = scalar_lea.sflag (!%p691_p5), [#allocation4], %s707_s25 }
  0x33   : > { %s179_s15 = scalar_lea.vmem (!%p691_p5), [#allocation3], %s365_s26 }
  0x36   : > { %546 = dma.done.wait (%p646_p8), %s176_s27, 128  }
  0x37   : > { %548 = vsyncadd (%p646_p8), %s176_s27, 4294967168  ;;  %s185_s5 = scalar_lea.sflag [#allocation7], %s707_s25  ;;  %s188_s16 = scalar_lea.vmem [#allocation6], %s365_s26 }
  0x38   : > { %550 = dma.done.wait (%p646_p8), %s185_s5, 128  }
  0x39   : > { %552 = vsyncadd (%p646_p8), %s185_s5, 4294967168  ;;  %v220_v0 = vld [vmem:[%s179_s15] sm:$0xff]  ;;  %v221_v1 = vld [vmem:[%s188_s16] sm:$0xff]  ;;  %s212_s18 = scalar_lea.vmem [#allocation8], %s707_s25  ;;  %s367_s19 = sshll.u32 %s571_s12, 4 }
  0x3a   : > { %v222_v2 = vsub.f32 %v220_v0, %v221_v1  ;;  %s257_s21 = sshll.u32 %s212_s18, 4  ;;  %s725_s7 = scalar_lea.hbm %s769_s2, %s367_s19  ;;  %s258_s21 = int_to_ptr.vmem [resolvable:$true] %s257_s21 }
  0x3b   : > { %s245_s8 = scalar_lea.sflag [#allocation5], %s707_s25  ;;  %s495_s30 = scalar_lea.vmem %s258_s21, 16 }
  0x3c   : > { %v223_v3 = vmul.f32 %v222_v2, %v222_v2  ;;  %p496_p8 = scmp.ne.s32.totalorder %s258_s21, %s495_s30  ;;  %s583_s4 = smov [#allocation8]  }
  0x3d   : > { %s499_s6 = sshll.u32 %s583_s4, 4  ;;  %s500_s6 = int_to_ptr.vmem [resolvable:$false] %s499_s6 }
  0x3e   : > { %232 = vadd.xlane.f32.xlu0 %v223_v3  ;;  %p497_p0 = pnand %p496_p8, %p650_p9  ;;  %s501_s12 = scalar_lea.vmem %s500_s6, 32 }
  0x3f   : > { %p502_p13 = scmp.lt.s32.totalorder %s258_s21, %s500_s6  ;;  %p503_p5 = scmp.lt.s32.totalorder %s501_s12, %s495_s30 }
  0x40   : > { %p498_p3 = pneg %p497_p0 }
  0x41   : > { %p504_p12 = por %p503_p5, %p502_p13 }
  0x43   : > { %p505_p6 = pnand %p504_p12, %p498_p3 }
  0xc7   : > { %v233_v4 = vpop.xlane.xlu0 %232 }
  0xc8   : > { %v234_v5 = vrot.slane %v233_v4, 4 }
  0xca   : > { %v235_v6 = vadd.f32 %v234_v5, %v233_v4 }
  0xcc   : > { %v236_v7 = vrot.slane %v235_v6, 2 }
  0xce   : > { %v237_v8 = vadd.f32 %v236_v7, %v235_v6 }
  0xd0   : > { %v238_v9 = vrot.slane %v237_v8, 1 }
  0xd2   : > { %v239_v10 = vadd.f32 %v238_v9, %v237_v8 }
  0xd4   : > { %370 = vpush %v239_v10 }
 0x105   : > { %s371_s20 = spop %370 }
 0x106   : > { %s241_s28 = smul.f32 0.0009765625, %s371_s20 }
 0x108   : > { %v242_v11 = vstv %s241_s28 }
 0x109   : > { %243 = vst [vmem:[%s212_s18] sm:$0x1] %v242_v11 }
 0x10a   : > { %508 = shalt.err (!%p505_p6)
}
 0x10b   : > { %s509_s26 = scalar_lea.hbm %s725_s7, 16  ;;  %s513_s15 = scalar_lea.hbm %s769_s2, 32 }
 0x10c   : > { %p510_p7 = scmp.ne.s32.totalorder %s725_s7, %s509_s26  ;;  %p514_p4 = scmp.lt.s32.totalorder %s725_s7, %s769_s2 }
 0x10d   : > { %p515_p10 = scmp.lt.s32.totalorder %s513_s15, %s509_s26 }
 0x10e   : > { %p511_p1 = pnand %p510_p7, %p650_p9 }
 0x10f   : > { %p516_p8 = por %p515_p10, %p514_p4 }
 0x110   : > { %p512_p2 = pneg %p511_p1 }
 0x112   : > { %p517_p0 = pnand %p516_p8, %p512_p2 }
 0x114   : > { %520 = shalt.err (!%p517_p0)
}
 0x115   : > { %376 = dma.vmem_to_hbm [thread:$0]  (%p650_p9), %s258_s21, 16, %s725_s7, %s245_s8  }
 0x116 PF: > { %s269_s18 = sand.u32 1, %s559_s9   ;;  %p776_p3 = scmp.ge.s32.totalorder %s579_s14, 2 }
 0x117   : > { %s270_s19 = scalar_lea.sflag [#allocation5], %s269_s18 }
 0x118   : > { %p386_p13 = pnand %p776_p3, %p657_p11 }
 0x11a   : > { %p387_p5 = pneg %p386_p13 }
 0x11c   : > { %554 = dma.done.wait (%p387_p5), %s270_s19, 16  }
 0x11d   : > { %556 = vsyncadd (%p387_p5), %s270_s19, 4294967280  ;;  %s21_s14 = sadd.s32 1, %s579_s14   ;;  %s777_s9 = smov %s563_s10 }
 0x11e   : > { %p18_p12 = scmp.ge.s32.totalorder %s21_s14, 4   ;;  %s778_s10 = smov %s567_s11 }
 0x11f   : > { %s779_s11 = smov %s655_s23  ;;  %s780_s12 = smov %s575_s13 }
 0x120   : > { %s781_s13 = smov %s783_s17  ;;  %20 = sbr.rel (!%p18_p12) target bundleno = 8 (0x8), region = 94 }
 0x125   :  { %274 = vsyncpa [#allocation4], 1 }
 0x126   :  { %276 = vsyncpa [#allocation4 + $0x1], 1 }
 0x127   :  { %277 = vsyncpa [#allocation7], 1 }
 0x128   :  { %279 = vsyncpa [#allocation7 + $0x1], 1 }
 0x129   :  { %280 = vsyncpa [#allocation5], 1 }
 0x12a   :  { %282 = vsyncpa [#allocation5 + $0x1], 1 }

</bundles_post_ra>
